<compile_context>
chip_gen: v7x
topology: tpu7x:2x2x1
jax: 0.10.0
libtpu: 0.0.40
codegen_flags: <defaults>
</compile_context>

<pallas_src>
import jax
import jax.numpy as jnp
from jax.experimental import pallas as pl
from jax.experimental.pallas import tpu as pltpu


# ----------------------------- Pallas kernel --------------------------------
def softq_kernel(x_ref, w1_ref, b1_ref, w2_ref, b2_ref, w3_ref, b3_ref,
                 out_ref):
    """One batch tile of the SAC Q-head MLP.

    All ops are strictly row-wise, so rows of a partial last batch block that
    lie past the real batch are garbage-in / garbage-out and get discarded by
    the masked output writeback.  Do NOT add cross-row ops (e.g. batch norm)
    without restoring explicit batch padding in the wrapper.
    """
    f32, bf16 = jnp.float32, jnp.bfloat16

    # Layer 1: Linear(44, 512) + ReLU.  x is pre-concatenated, pre-cast bf16.
    h1 = jnp.dot(x_ref[...], w1_ref[...], preferred_element_type=f32)
    h1 = jnp.maximum(h1 + b1_ref[...], 0.0)                 # f32 bias + ReLU (VPU)

    # Layer 2: Linear(512, 256) + ReLU (bf16 MXU inputs, f32 accumulation).
    h2 = jnp.dot(h1.astype(bf16), w2_ref[...], preferred_element_type=f32)
    h2 = jnp.maximum(h2 + b2_ref[...], 0.0)

    # Layer 3: Linear(256, 1), last_act=False.  N=1 matmul wastes the MXU ->
    # VPU multiply + lane reduction against w3 stored as a (1, 256) f32 row.
    q = jnp.sum(h2 * w3_ref[...], axis=-1, keepdims=True) + b3_ref[...]
    out_ref[...] = q.astype(out_ref.dtype)


# ------------------------------ wrapper --------------------------------------
def softq_forward(visual_feature, state, action, params, *,
                  max_tb=1024, core_parallel=False):
    """Q(obs, action) with the MLP head fused into one Pallas kernel.

    Grid over the batch dimension only; weights stay VMEM-resident across grid
    steps.  The last batch block may be partial (no explicit padding).
    Set core_parallel=True on v7x to shard the batch axis across both
    TensorCores.
    """
    b = visual_feature.shape[0]

    # Wrapper-side concat + bf16 cast: one lane-dense bf16 input stream
    # (half the activation HBM traffic, one DMA stream instead of three,
    # single K=44 matmul in layer 1, no in-kernel input casts).
    x = jnp.concatenate([visual_feature, state, action], axis=1).astype(jnp.bfloat16)
    in_dim = x.shape[1]

    # Batch tile: multiple of 8 sublanes, capped at max_tb.
    tb = min(max_tb, pl.cdiv(b, 8) * 8)
    if core_parallel:
        # v7x: keep >= 2 grid steps so both TensorCores get work.
        tb = min(tb, max(8, pl.cdiv(pl.cdiv(b, 2), 8) * 8))
    grid = (pl.cdiv(b, tb),)

    w_spec = lambda a: pl.BlockSpec(a.shape, lambda i: (0, 0))   # VMEM-resident

    compiler_params = pltpu.CompilerParams(
        dimension_semantics=((pltpu.CORE_PARALLEL,) if core_parallel
                             else ("parallel",)),
        # Per-step f32 intermediates + double-buffered blocks only approach the
        # 32 MiB scoped default around tb ~ 8192; guard very aggressive tiles.
        vmem_limit_bytes=(64 << 20) if tb > 4096 else None,
    )

    out = pl.pallas_call(
        softq_kernel,
        out_shape=jax.ShapeDtypeStruct((b, 1), jnp.float32),
        grid=grid,
        in_specs=[
            pl.BlockSpec((tb, in_dim), lambda i: (i, 0)),
            w_spec(params["w1"]), w_spec(params["b1"]),
            w_spec(params["w2"]), w_spec(params["b2"]),
            w_spec(params["w3"]), w_spec(params["b3"]),
        ],
        out_specs=pl.BlockSpec((tb, 1), lambda i: (i, 0)),
        compiler_params=compiler_params,
    )(x, params["w1"], params["b1"], params["w2"], params["b2"],
      params["w3"], params["b3"])
    return out


# ------------------------- deterministic parameter init ----------------------
def init_params(key, vis_dim, state_dim, act_dim, hidden=(512, 256, 1)):
    """PyTorch-nn.Linear-style uniform init, weights stored as [in, out].

    MXU weights (w1, w2) stored in bf16; biases and the final (1, 256)
    row-vector w3 stay f32 (VPU path, f32 accumulation everywhere).
    """
    in_dim = vis_dim + state_dim + act_dim
    f32, bf16 = jnp.float32, jnp.bfloat16
    params = {}

    key, kw, kb = jax.random.split(key, 3)
    bound = in_dim ** -0.5
    params["w1"] = jax.random.uniform(
        kw, (in_dim, hidden[0]), f32, -bound, bound).astype(bf16)
    params["b1"] = jax.random.uniform(kb, (1, hidden[0]), f32, -bound, bound)

    key, kw, kb = jax.random.split(key, 3)
    bound = hidden[0] ** -0.5
    params["w2"] = jax.random.uniform(
        kw, (hidden[0], hidden[1]), f32, -bound, bound).astype(bf16)
    params["b2"] = jax.random.uniform(kb, (1, hidden[1]), f32, -bound, bound)

    key, kw, kb = jax.random.split(key, 3)
    bound = hidden[1] ** -0.5
    # Final Linear(256, 1): stored as a (1, 256) f32 row for the VPU-mul+reduce.
    params["w3"] = jax.random.uniform(kw, (1, hidden[1]), f32, -bound, bound)
    params["b3"] = jax.random.uniform(kb, (1, 1), f32, -bound, bound)
    return params


# ------------------------------ reference ------------------------------------
def softq_ref(visual_feature, state, action, params):
    """Plain-JAX reference with the same precision policy as the kernel."""
    f32, bf16 = jnp.float32, jnp.bfloat16
    x = jnp.concatenate([visual_feature, state, action],
                        axis=1).astype(bf16).astype(f32)
    h1 = jnp.maximum(x @ params["w1"].astype(f32) + params["b1"], 0.0)
    h2 = jnp.maximum(h1.astype(bf16).astype(f32) @ params["w2"].astype(f32)
                     + params["b2"], 0.0)
    return jnp.sum(h2 * params["w3"], axis=-1, keepdims=True) + params["b3"]


if __name__ == "__main__":
    # Small shapes consistent with the module:
    #   batch=2, encoder.out_dim=32, state_dim=8, action_dim=4
    B, VIS_DIM, STATE_DIM, ACT_DIM = 2, 32, 8, 4

    key = jax.random.PRNGKey(0)
    k_vis, k_state, k_act, k_params = jax.random.split(key, 4)

    visual_feature = jax.random.normal(k_vis, (B, VIS_DIM), jnp.float32)
    state = jax.random.normal(k_state, (B, STATE_DIM), jnp.float32)
    action = jax.random.uniform(k_act, (B, ACT_DIM), jnp.float32,
                                minval=-1.0, maxval=1.0)

    params = init_params(k_params, VIS_DIM, STATE_DIM, ACT_DIM)

    q = softq_forward(visual_feature, state, action, params)
    q = jax.block_until_ready(q)

    q_ref = softq_ref(visual_feature, state, action, params)
    assert q.shape == (B, 1)
    assert jnp.allclose(q, q_ref, atol=2e-2, rtol=2e-2), (q, q_ref)

    print("KERNEL_OK")
</pallas_src>

<mosaic_0001>
module attributes {stable_mosaic.version = 11 : i64} {
  func.func @softq_kernel(%arg0: i32, %arg1: memref<8x44xbf16, #tpu.memory_space<vmem>>, %arg2: memref<44x512xbf16, #tpu.memory_space<vmem>>, %arg3: memref<1x512xf32, #tpu.memory_space<vmem>>, %arg4: memref<512x256xbf16, #tpu.memory_space<vmem>>, %arg5: memref<1x256xf32, #tpu.memory_space<vmem>>, %arg6: memref<1x256xf32, #tpu.memory_space<vmem>>, %arg7: memref<1x1xf32, #tpu.memory_space<vmem>>, %arg8: memref<8x1xf32, #tpu.memory_space<vmem>>) attributes {dimension_semantics = [#tpu.dimension_semantics<parallel>], iteration_bounds = array<i64: 1>, scalar_prefetch = 0 : i64, scratch_operands = 0 : i64, tpu.core_type = #tpu.core_type<tc>, window_params = [{transform_indices = @transform_0, window_bounds = array<i64: 8, 44>}, {pipeline_mode = #tpu.pipeline_mode<synchronous>, transform_indices = @transform_1, window_bounds = array<i64: 44, 512>}, {pipeline_mode = #tpu.pipeline_mode<synchronous>, transform_indices = @transform_2, window_bounds = array<i64: 1, 512>}, {pipeline_mode = #tpu.pipeline_mode<synchronous>, transform_indices = @transform_3, window_bounds = array<i64: 512, 256>}, {pipeline_mode = #tpu.pipeline_mode<synchronous>, transform_indices = @transform_4, window_bounds = array<i64: 1, 256>}, {pipeline_mode = #tpu.pipeline_mode<synchronous>, transform_indices = @transform_5, window_bounds = array<i64: 1, 256>}, {pipeline_mode = #tpu.pipeline_mode<synchronous>, transform_indices = @transform_6, window_bounds = array<i64: 1, 1>}, {transform_indices = @transform_7, window_bounds = array<i64: 8, 1>}]} {
    %c0 = arith.constant 0 : index
    %c0_0 = arith.constant 0 : index
    %0 = vector.load %arg1[%c0, %c0_0] : memref<8x44xbf16, #tpu.memory_space<vmem>>, vector<8x44xbf16>
    %c0_1 = arith.constant 0 : index
    %c0_2 = arith.constant 0 : index
    %1 = vector.load %arg2[%c0_1, %c0_2] : memref<44x512xbf16, #tpu.memory_space<vmem>>, vector<44x512xbf16>
    %cst = arith.constant dense<0.000000e+00> : vector<8x512xf32>
    %2 = tpu.matmul %0, %1, %cst {dimension_numbers = #tpu.dot_dimension_numbers<[1], [0], [0], [1], [0, 0, 1, 1], [], []>} : vector<8x44xbf16>, vector<44x512xbf16>, vector<8x512xf32> -> vector<8x512xf32>
    %c0_3 = arith.constant 0 : index
    %c0_4 = arith.constant 0 : index
    %3 = vector.load %arg3[%c0_3, %c0_4] : memref<1x512xf32, #tpu.memory_space<vmem>>, vector<1x512xf32>
    %4 = vector.broadcast %3 : vector<1x512xf32> to vector<8x512xf32>
    %5 = arith.addf %2, %4 : vector<8x512xf32>
    %cst_5 = arith.constant 0.000000e+00 : f32
    %6 = vector.broadcast %cst_5 : f32 to vector<8x512xf32>
    %7 = arith.maximumf %5, %6 : vector<8x512xf32>
    %8 = arith.truncf %7 : vector<8x512xf32> to vector<8x512xbf16>
    %c0_6 = arith.constant 0 : index
    %c0_7 = arith.constant 0 : index
    %9 = vector.load %arg4[%c0_6, %c0_7] : memref<512x256xbf16, #tpu.memory_space<vmem>>, vector<512x256xbf16>
    %cst_8 = arith.constant dense<0.000000e+00> : vector<8x256xf32>
    %10 = tpu.matmul %8, %9, %cst_8 {dimension_numbers = #tpu.dot_dimension_numbers<[1], [0], [0], [1], [0, 0, 1, 1], [], []>} : vector<8x512xbf16>, vector<512x256xbf16>, vector<8x256xf32> -> vector<8x256xf32>
    %c0_9 = arith.constant 0 : index
    %c0_10 = arith.constant 0 : index
    %11 = vector.load %arg5[%c0_9, %c0_10] : memref<1x256xf32, #tpu.memory_space<vmem>>, vector<1x256xf32>
    %12 = vector.broadcast %11 : vector<1x256xf32> to vector<8x256xf32>
    %13 = arith.addf %10, %12 : vector<8x256xf32>
    %cst_11 = arith.constant 0.000000e+00 : f32
    %14 = vector.broadcast %cst_11 : f32 to vector<8x256xf32>
    %15 = arith.maximumf %13, %14 : vector<8x256xf32>
    %c0_12 = arith.constant 0 : index
    %c0_13 = arith.constant 0 : index
    %16 = vector.load %arg6[%c0_12, %c0_13] : memref<1x256xf32, #tpu.memory_space<vmem>>, vector<1x256xf32>
    %17 = vector.broadcast %16 : vector<1x256xf32> to vector<8x256xf32>
    %18 = arith.mulf %15, %17 : vector<8x256xf32>
    %cst_14 = arith.constant dense<0.000000e+00> : vector<8xf32>
    %19 = vector.multi_reduction <add>, %18, %cst_14 [1] : vector<8x256xf32> to vector<8xf32>
    %20 = vector.shape_cast %19 : vector<8xf32> to vector<8x1xf32>
    %c0_15 = arith.constant 0 : index
    %c0_16 = arith.constant 0 : index
    %21 = vector.load %arg7[%c0_15, %c0_16] : memref<1x1xf32, #tpu.memory_space<vmem>>, vector<1x1xf32>
    %22 = vector.broadcast %21 : vector<1x1xf32> to vector<8x1xf32>
    %23 = arith.addf %20, %22 : vector<8x1xf32>
    %c0_17 = arith.constant 0 : index
    %c0_18 = arith.constant 0 : index
    %24 = vector.load %arg8[%c0_17, %c0_18] : memref<8x1xf32, #tpu.memory_space<vmem>>, vector<8x1xf32>
    tpu.vector_store %arg8[%c0_17, %c0_18], %23 {strides = array<i32>} : memref<8x1xf32, #tpu.memory_space<vmem>>, vector<8x1xf32>,
    return
  }
  func.func @transform_0(%arg0: i32) -> (i32, i32) {
    %c0_i32 = arith.constant 0 : i32
    %c0_i32_0 = arith.constant 0 : i32
    return %arg0, %c0_i32 : i32, i32
  }
  func.func @transform_1(%arg0: i32) -> (i32, i32) {
    %c0_i32 = arith.constant 0 : i32
    %c0_i32_0 = arith.constant 0 : i32
    %c0_i32_1 = arith.constant 0 : i32
    return %c0_i32, %c0_i32_0 : i32, i32
  }
  func.func @transform_2(%arg0: i32) -> (i32, i32) {
    %c0_i32 = arith.constant 0 : i32
    %c0_i32_0 = arith.constant 0 : i32
    %c0_i32_1 = arith.constant 0 : i32
    return %c0_i32, %c0_i32_0 : i32, i32
  }
  func.func @transform_3(%arg0: i32) -> (i32, i32) {
    %c0_i32 = arith.constant 0 : i32
    %c0_i32_0 = arith.constant 0 : i32
    %c0_i32_1 = arith.constant 0 : i32
    return %c0_i32, %c0_i32_0 : i32, i32
  }
  func.func @transform_4(%arg0: i32) -> (i32, i32) {
    %c0_i32 = arith.constant 0 : i32
    %c0_i32_0 = arith.constant 0 : i32
    %c0_i32_1 = arith.constant 0 : i32
    return %c0_i32, %c0_i32_0 : i32, i32
  }
  func.func @transform_5(%arg0: i32) -> (i32, i32) {
    %c0_i32 = arith.constant 0 : i32
    %c0_i32_0 = arith.constant 0 : i32
    %c0_i32_1 = arith.constant 0 : i32
    return %c0_i32, %c0_i32_0 : i32, i32
  }
  func.func @transform_6(%arg0: i32) -> (i32, i32) {
    %c0_i32 = arith.constant 0 : i32
    %c0_i32_0 = arith.constant 0 : i32
    %c0_i32_1 = arith.constant 0 : i32
    return %c0_i32, %c0_i32_0 : i32, i32
  }
  func.func @transform_7(%arg0: i32) -> (i32, i32) {
    %c0_i32 = arith.constant 0 : i32
    %c0_i32_0 = arith.constant 0 : i32
    return %arg0, %c0_i32 : i32, i32
  }
}

</mosaic_0001>

<bundles_post_ra>
// kernel: tpu_custom_call.1
= control target key start
LH: loop header
LB: loop body
LE: loop exit
PB: predicated region body
PF: predicated region fallthrough
CT: control target
= control target key end

     0   :  { %s1195_s0 = inlined_call_operand.vmem [shape: bf16[2,44], index: 0, kind: input, shape index: {}]   ;;  %s1196_s1 = inlined_call_operand.hbm [shape: bf16[44,512], index: 1, kind: input, shape index: {}]   ;;  %s1197_s2 = inlined_call_operand.vmem [shape: f32[1,512], index: 2, kind: input, shape index: {}]   ;;  %s1198_s3 = inlined_call_operand.hbm [shape: bf16[512,256], index: 3, kind: input, shape index: {}]   ;;  %s1199_s4 = inlined_call_operand.vmem [shape: f32[1,256], index: 4, kind: input, shape index: {}]   ;;  %s1200_s5 = inlined_call_operand.vmem [shape: f32[1,256], index: 5, kind: input, shape index: {}]   ;;  %s1201_s6 = inlined_call_operand.<no memory space> [shape: f32[1,1], index: 6, kind: input, shape index: {}]   ;;  %s1202_s7 = inlined_call_operand.vmem [shape: f32[2,1], index: 7, kind: output, shape index: {}]  }
   0x1   :  { %v12_v0 = vstv %s1201_s6 }
   0x2   :  { %13 = vst [vmem:[#allocation2] sm:$0x1] %v12_v0 }
   0x3   :  { %14 = vsyncpa [#allocation4], 0 }
   0x4   :  { %15 = vsyncpa [#allocation6], 0  ;;  %s1089_s26 = smov [#allocation3]   ;;  %s1041_s30 = scalar_lea.hbm %s1196_s1, 1536 }
   0x5   :  { %s23_s27 = sshll.u32 %s1089_s26, 4  ;;  %p1042_p0 = scmp.ne.s32.totalorder %s1196_s1, %s1041_s30  ;;  %s24_s27 = int_to_ptr.vmem [resolvable:$true] %s23_s27 }
   0x6   :  { %p1045_p1 = scmp.lt.u32.totalorder %s1041_s30, %s1196_s1 }
   0x8   :  { %p1047_p2 = pnand %p1045_p1, %p1042_p0 }
   0xa   :  { %1050 = shalt.err (!%p1047_p2)
}
   0xb   :  { %s1051_s6 = scalar_lea.vmem %s24_s27, 1536  ;;  %p1056_p4 = scmp.lt.s32.totalorder %s24_s27, %s24_s27 }
   0xc   :  { %p1052_p3 = scmp.ne.s32.totalorder %s24_s27, %s1051_s6  ;;  %p1057_p5 = scmp.lt.s32.totalorder %s1051_s6, %s1051_s6 }
   0xe   :  { %p1058_p6 = por %p1057_p5, %p1056_p4 }
  0x10   :  { %p1059_p7 = pnand %p1058_p6, %p1052_p3 }
  0x12   :  { %1062 = shalt.err (!%p1059_p7)
}
  0x13   :  { %s1090_s12 = smov 256   ;;  %s1091_s13 = smov 16  }
  0x14   :  { %29 = dma.hbm_to_vmem [thread:$0]  %s1196_s1, 1536, %s24_s27, [#allocation4], %s1090_s12, %s1090_s12, %s1091_s13  }
  0x15   :  { %s1092_s16 = smov [#allocation5]   ;;  %s1063_s20 = scalar_lea.hbm %s1198_s3, 8192 }
  0x16   :  { %s37_s17 = sshll.u32 %s1092_s16, 4  ;;  %p1064_p8 = scmp.ne.s32.totalorder %s1198_s3, %s1063_s20  ;;  %s38_s17 = int_to_ptr.vmem [resolvable:$true] %s37_s17 }
  0x17   :  { %p1067_p9 = scmp.lt.u32.totalorder %s1063_s20, %s1198_s3 }
  0x19   :  { %p1069_p10 = pnand %p1067_p9, %p1064_p8 }
  0x1b   :  { %1072 = shalt.err (!%p1069_p10)
}
  0x1c   :  { %s1073_s25 = scalar_lea.vmem %s38_s17, 8192  ;;  %p1078_p12 = scmp.lt.s32.totalorder %s38_s17, %s38_s17 }
  0x1d   :  { %p1074_p11 = scmp.ne.s32.totalorder %s38_s17, %s1073_s25  ;;  %p1079_p13 = scmp.lt.s32.totalorder %s1073_s25, %s1073_s25 }
  0x1f   :  { %p1080_p0 = por %p1079_p13, %p1078_p12 }
  0x21   :  { %p1081_p1 = pnand %p1080_p0, %p1074_p11 }
  0x23   :  { %1084 = shalt.err (!%p1081_p1)
}
  0x24   :  { %s1093_s1 = smov 128   ;;  %s1094_s26 = smov 8  }
  0x25   :  { %43 = dma.hbm_to_vmem [thread:$0]  %s1198_s3, 8192, %s38_s17, [#allocation6], %s1093_s1, %s1093_s1, %s1094_s26  }
  0x26   :  { %1085 = dma.done.wait [#allocation4], 1536  }
  0x27   :  { %1086 = vsyncadd [#allocation4], 4294965760 }
  0x28   :  { %1087 = dma.done.wait [#allocation6], 8192  }
  0x29   :  { %1088 = vsyncadd [#allocation6], 4294959104  ;;  %v1095_v1 = vmov 0   ;;  %v927_v2 = vld [vmem:[#allocation3 + $0x4] ss:$16 sps:$4 sm:$0xff]   ;;  %v75_v3 = vlaneseq  ;;  %vm183_vm0 = vcmask 1045504  }
  0x2a   :  { %228 = vmatprep.mubr.bf16.mxu0 %v1095_v1  ;;  %269 = vmatprep.mubr.bf16.mxu1 %v1095_v1  ;;  %v1096_v4 = vmov 1966171168   ;;  %v929_v6 = vld [vmem:[#allocation3 + $0xc] ss:$16 sps:$4 sm:$0xff]   ;;  %v931_v7 = vld [vmem:[#allocation3] ss:$16 sps:$4 sm:$0xff]  }
  0x2b   :  { %v102_v5 = vunpack.c.l.s4 %v1096_v4  ;;  %196 = vmatprep.subr.bf16.mxu0 %v927_v2  ;;  %v932_v8 = vld [vmem:[#allocation3 + $0x8] ss:$16 sps:$4 sm:$0xff]   ;;  %237 = vmatprep.subr.bf16.mxu1 %v929_v6  ;;  %v933_v9 = vld [vmem:[#allocation3 + $0x24] ss:$16 sps:$4 sm:$0xff]   ;;  %v935_v10 = vld [vmem:[#allocation3 + $0x2c] ss:$16 sps:$4 sm:$0xff]  }
  0x2c   :  { %197 = vmatpush1.bf16.msra.mxu0 %v931_v7  ;;  %238 = vmatpush1.bf16.msra.mxu1 %v932_v8  ;;  %v937_v11 = vld [vmem:[#allocation3 + $0x20] ss:$16 sps:$4 sm:$0xff]   ;;  %v1164_v12 = vshrl.u32 %v75_v3, 7  ;;  %v938_v14 = vld [vmem:[#allocation3 + $0x28] ss:$16 sps:$4 sm:$0xff]   ;;  %vm179_vm1 = vcmask 359424  }
  0x2d   :  { %v103_v13 = vunpack.c.0.s8 %v102_v5  ;;  %198 = vmatprep.subr.bf16.mxu0 %v933_v9  ;;  %239 = vmatprep.subr.bf16.mxu1 %v935_v10  ;;  %v939_v15 = vld [vmem:[#allocation3 + $0x44] ss:$16 sps:$4 sm:$0x3f]   ;;  %v941_v16 = vld [vmem:[#allocation3 + $0x4c] ss:$16 sps:$4 sm:$0x3f]  }
  0x2e   :  { %v943_v17 = vld [vmem:[#allocation3 + $0x40] ss:$16 sps:$4 sm:$0x3f]   ;;  %v944_v18 = vld [vmem:[#allocation3 + $0x48] ss:$16 sps:$4 sm:$0x3f]  }
  0x2f   :  { %v57_v19 = vld [vmem:[%s1195_s0] sm:$0x1]  ;;  %v106_v20 = vsub.s32 %v103_v13, %v1164_v12  ;;  %v185_v21 = vsel %vm183_vm0, %v943_v17, 0  ;;  %v58_v22 = vld [vmem:[%s1195_s0 + $0x1] sm:$0x1]  ;;  %v191_v24 = vsel %vm183_vm0, %v944_v18, 0 }
  0x30   :  { %199 = vmatpush1.bf16.msra.mxu0 %v937_v11  ;;  %240 = vmatpush1.bf16.msra.mxu1 %v938_v14  ;;  %v59_v23 = vld [vmem:[%s1195_s0 + $0x2] sm:$0x1]  ;;  %v60_v25 = vld [vmem:[%s1195_s0 + $0x3] sm:$0x1]  ;;  %v99_v26 = vcombine.low %v57_v19, %v58_v22  ;;  %v947_v28 = vld [vmem:[#allocation5 + $0x4] ss:$8 sps:$4 sm:$0xff]  }
  0x31   :  { %846 = vmatprep.subr.msk.bf16.mxu0 %vm183_vm0, %v939_v15  ;;  %848 = vmatprep.subr.msk.bf16.mxu1 %vm183_vm0, %v941_v16  ;;  %v100_v27 = vcombine.low %v59_v23, %v60_v25  ;;  %v950_v30 = vld [vmem:[#allocation5 + $0x104] ss:$8 sps:$4 sm:$0xff]   ;;  %v945_v33 = vld [vmem:[#allocation5] ss:$8 sps:$4 sm:$0xff]   ;;  %v953_v36 = vld [vmem:[#allocation5 + $0x14] ss:$8 sps:$4 sm:$0xff]  }
  0x32   :  { %v107_v29 = vrot.slane %v99_v26, %v106_v20  ;;  %v948_v34 = vld [vmem:[#allocation5 + $0x100] ss:$8 sps:$4 sm:$0xff]   ;;  %v956_v37 = vld [vmem:[#allocation5 + $0x114] ss:$8 sps:$4 sm:$0xff]   ;;  %v951_v38 = vld [vmem:[#allocation5 + $0x10] ss:$8 sps:$4 sm:$0xff]  }
  0x33   :  { %v114_v31 = vrot.slane %v100_v27, %v106_v20  ;;  %v954_v39 = vld [vmem:[#allocation5 + $0x110] ss:$8 sps:$4 sm:$0xff]   ;;  %v959_v40 = vld [vmem:[#allocation5 + $0x24] ss:$8 sps:$4 sm:$0xff]   ;;  %v957_v42 = vld [vmem:[#allocation5 + $0x20] ss:$8 sps:$4 sm:$0xff]  }
  0x34   :  { %201 = vmatpush1.bf16.msra.mxu0 %v185_v21  ;;  %242 = vmatpush1.bf16.msra.mxu1 %v191_v24  ;;  %v962_v41 = vld [vmem:[#allocation5 + $0x124] ss:$8 sps:$4 sm:$0xff]   ;;  %v960_v43 = vld [vmem:[#allocation5 + $0x120] ss:$8 sps:$4 sm:$0xff]   ;;  %v965_v44 = vld [vmem:[#allocation5 + $0x34] ss:$8 sps:$4 sm:$0xff]  }
  0x35   :  { %682 = vmatprep.subr.bf16.mxu1 %v947_v28  ;;  %723 = vmatprep.subr.bf16.mxu0 %v950_v30  ;;  %v115_v32 = vcombine.low %v107_v29, %v114_v31  ;;  %v968_v45 = vld [vmem:[#allocation5 + $0x134] ss:$8 sps:$4 sm:$0xff]   ;;  %v963_v46 = vld [vmem:[#allocation5 + $0x30] ss:$8 sps:$4 sm:$0xff]   ;;  %v971_v48 = vld [vmem:[#allocation5 + $0x44] ss:$8 sps:$4 sm:$0xff]  }
  0x36   :  { %v966_v47 = vld [vmem:[#allocation5 + $0x130] ss:$8 sps:$4 sm:$0xff]   ;;  %v974_v49 = vld [vmem:[#allocation5 + $0x144] ss:$8 sps:$4 sm:$0xff]   ;;  %v969_v50 = vld [vmem:[#allocation5 + $0x40] ss:$8 sps:$4 sm:$0xff]  }
  0x37   :  { %v122_v35 = vrot.slane %v115_v32, %v106_v20  ;;  %v972_v51 = vld [vmem:[#allocation5 + $0x140] ss:$8 sps:$4 sm:$0xff]   ;;  %v977_v52 = vld [vmem:[#allocation5 + $0x54] ss:$8 sps:$4 sm:$0xff]   ;;  %v975_v54 = vld [vmem:[#allocation5 + $0x50] ss:$8 sps:$4 sm:$0xff]  }
  0x38   :  { %v980_v53 = vld [vmem:[#allocation5 + $0x154] ss:$8 sps:$4 sm:$0xff]   ;;  %v978_v55 = vld [vmem:[#allocation5 + $0x150] ss:$8 sps:$4 sm:$0xff]   ;;  %v983_v56 = vld [vmem:[#allocation5 + $0x64] ss:$8 sps:$4 sm:$0xff]  }
  0x39   :  { %847 = vmatmul.mubr.msk.bf16.vlgmr.msra.gmra.mrb[0].mxu0 %vm179_vm1, %v122_v35  ;;  %849 = vmatmul.mubr.msk.bf16.vlgmr.msra.gmra.mrb[0].mxu1 %vm179_vm1, %v122_v35  ;;  %v986_v57 = vld [vmem:[#allocation5 + $0x164] ss:$8 sps:$4 sm:$0xff]   ;;  %v981_v58 = vld [vmem:[#allocation5 + $0x60] ss:$8 sps:$4 sm:$0xff]   ;;  %v989_v60 = vld [vmem:[#allocation5 + $0x74] ss:$8 sps:$4 sm:$0xff]  }
  0x3a   :  { %683 = vmatpush1.bf16.msra.mxu1 %v945_v33  ;;  %724 = vmatpush1.bf16.msra.mxu0 %v948_v34  ;;  %v984_v59 = vld [vmem:[#allocation5 + $0x160] ss:$8 sps:$4 sm:$0xff]   ;;  %v992_v61 = vld [vmem:[#allocation5 + $0x174] ss:$8 sps:$4 sm:$0xff]   ;;  %v987_v62 = vld [vmem:[#allocation5 + $0x70] ss:$8 sps:$4 sm:$0xff]  }
  0x3b   :  { %684 = vmatprep.subr.bf16.mxu1 %v953_v36  ;;  %725 = vmatprep.subr.bf16.mxu0 %v956_v37  ;;  %v990_v63 = vld [vmem:[#allocation5 + $0x170] ss:$8 sps:$4 sm:$0xff]   ;;  %v995_v0 = vld [vmem:[#allocation5 + $0x84] ss:$8 sps:$4 sm:$0xff]   ;;  %v993_v2 = vld [vmem:[#allocation5 + $0x80] ss:$8 sps:$4 sm:$0xff]  }
  0x3c   :  { %v998_v1 = vld [vmem:[#allocation5 + $0x184] ss:$8 sps:$4 sm:$0xff]   ;;  %v996_v3 = vld [vmem:[#allocation5 + $0x180] ss:$8 sps:$4 sm:$0xff]   ;;  %v1001_v4 = vld [vmem:[#allocation5 + $0x94] ss:$8 sps:$4 sm:$0xff]  }
  0x3d   :  { %v1004_v5 = vld [vmem:[#allocation5 + $0x194] ss:$8 sps:$4 sm:$0xff]   ;;  %v999_v6 = vld [vmem:[#allocation5 + $0x90] ss:$8 sps:$4 sm:$0xff]   ;;  %v1007_v8 = vld [vmem:[#allocation5 + $0xa4] ss:$8 sps:$4 sm:$0xff]  }
  0x3e   :  { %685 = vmatpush1.bf16.msra.mxu1 %v951_v38  ;;  %726 = vmatpush1.bf16.msra.mxu0 %v954_v39  ;;  %v1002_v7 = vld [vmem:[#allocation5 + $0x190] ss:$8 sps:$4 sm:$0xff]   ;;  %v1010_v9 = vld [vmem:[#allocation5 + $0x1a4] ss:$8 sps:$4 sm:$0xff]   ;;  %v1005_v10 = vld [vmem:[#allocation5 + $0xa0] ss:$8 sps:$4 sm:$0xff]  }
  0x3f   :  { %686 = vmatprep.subr.bf16.mxu1 %v959_v40  ;;  %727 = vmatprep.subr.bf16.mxu0 %v962_v41  ;;  %v1008_v11 = vld [vmem:[#allocation5 + $0x1a0] ss:$8 sps:$4 sm:$0xff]   ;;  %v1013_v13 = vld [vmem:[#allocation5 + $0xb4] ss:$8 sps:$4 sm:$0xff]   ;;  %v1011_v15 = vld [vmem:[#allocation5 + $0xb0] ss:$8 sps:$4 sm:$0xff]  }
  0x40   :  { %v1016_v14 = vld [vmem:[#allocation5 + $0x1b4] ss:$8 sps:$4 sm:$0xff]   ;;  %v1014_v16 = vld [vmem:[#allocation5 + $0x1b0] ss:$8 sps:$4 sm:$0xff]   ;;  %v1019_v17 = vld [vmem:[#allocation5 + $0xc4] ss:$8 sps:$4 sm:$0xff]  }
  0x41   :  { %v1022_v18 = vld [vmem:[#allocation5 + $0x1c4] ss:$8 sps:$4 sm:$0xff]   ;;  %v1017_v19 = vld [vmem:[#allocation5 + $0xc0] ss:$8 sps:$4 sm:$0xff]   ;;  %v1025_v21 = vld [vmem:[#allocation5 + $0xd4] ss:$8 sps:$4 sm:$0xff]  }
  0x42   :  { %687 = vmatpush1.bf16.msra.mxu1 %v957_v42  ;;  %728 = vmatpush1.bf16.msra.mxu0 %v960_v43  ;;  %v1020_v20 = vld [vmem:[#allocation5 + $0x1c0] ss:$8 sps:$4 sm:$0xff]   ;;  %v1028_v22 = vld [vmem:[#allocation5 + $0x1d4] ss:$8 sps:$4 sm:$0xff]   ;;  %v1023_v23 = vld [vmem:[#allocation5 + $0xd0] ss:$8 sps:$4 sm:$0xff]  }
  0x43   :  { %688 = vmatprep.subr.bf16.mxu1 %v965_v44  ;;  %729 = vmatprep.subr.bf16.mxu0 %v968_v45  ;;  %v1026_v24 = vld [vmem:[#allocation5 + $0x1d0] ss:$8 sps:$4 sm:$0xff]   ;;  %v1031_v25 = vld [vmem:[#allocation5 + $0xe4] ss:$8 sps:$4 sm:$0xff]   ;;  %v1029_v27 = vld [vmem:[#allocation5 + $0xe0] ss:$8 sps:$4 sm:$0xff]  }
  0x44   :  { %v1034_v26 = vld [vmem:[#allocation5 + $0x1e4] ss:$8 sps:$4 sm:$0xff]   ;;  %v1032_v28 = vld [vmem:[#allocation5 + $0x1e0] ss:$8 sps:$4 sm:$0xff]   ;;  %v1037_v29 = vld [vmem:[#allocation5 + $0xf4] ss:$8 sps:$4 sm:$0xff]  }
  0x45   :  { %v1040_v30 = vld [vmem:[#allocation5 + $0x1f4] ss:$8 sps:$4 sm:$0xff]   ;;  %v1035_v31 = vld [vmem:[#allocation5 + $0xf0] ss:$8 sps:$4 sm:$0xff]   ;;  %v77_v33 = vsub.s32 0, %v1164_v12  ;;  %v85_v34 = vsub.s32 2, %v1164_v12 }
  0x46   :  { %689 = vmatpush1.bf16.msra.mxu1 %v963_v46  ;;  %730 = vmatpush1.bf16.msra.mxu0 %v966_v47  ;;  %v1038_v32 = vld [vmem:[#allocation5 + $0x1f0] ss:$8 sps:$4 sm:$0xff]   ;;  %v73_v35 = vld [vmem:[%s1197_s2] sm:$0xf]  ;;  %v81_v36 = vsub.s32 1, %v1164_v12  ;;  %v89_v37 = vsub.s32 3, %v1164_v12 }
  0x47   :  { %690 = vmatprep.subr.bf16.mxu1 %v971_v48  ;;  %731 = vmatprep.subr.bf16.mxu0 %v974_v49  ;;  %v78_v38 = vrot.slane %v73_v35, %v77_v33  ;;  %v86_v39 = vrot.slane %v73_v35, %v85_v34  ;;  %vm791_vm2 = vcmask 7168  }
  0x48   :  { %v82_v40 = vrot.slane %v73_v35, %v81_v36  ;;  %v90_v41 = vrot.slane %v73_v35, %v89_v37 }
  0x4a   :  { %691 = vmatpush1.bf16.msra.mxu1 %v969_v50  ;;  %732 = vmatpush1.bf16.msra.mxu0 %v972_v51 }
  0x4b   :  { %692 = vmatprep.subr.bf16.mxu1 %v977_v52  ;;  %733 = vmatprep.subr.bf16.mxu0 %v980_v53 }
  0x4e   :  { %693 = vmatpush1.bf16.msra.mxu1 %v975_v54  ;;  %734 = vmatpush1.bf16.msra.mxu0 %v978_v55 }
  0x4f   :  { %694 = vmatprep.subr.bf16.mxu1 %v983_v56  ;;  %735 = vmatprep.subr.bf16.mxu0 %v986_v57 }
  0x52   :  { %695 = vmatpush1.bf16.msra.mxu1 %v981_v58  ;;  %736 = vmatpush1.bf16.msra.mxu0 %v984_v59 }
  0x53   :  { %696 = vmatprep.subr.bf16.mxu1 %v989_v60  ;;  %737 = vmatprep.subr.bf16.mxu0 %v992_v61  ;;  %v350_v61 = vld [vmem:[%s1199_s4] sm:$0x3] }
  0x56   :  { %697 = vmatpush1.bf16.msra.mxu1 %v987_v62  ;;  %738 = vmatpush1.bf16.msra.mxu0 %v990_v63  ;;  %v355_v62 = vrot.slane %v350_v61, %v77_v33  ;;  %v359_v63 = vrot.slane %v350_v61, %v81_v36 }
  0x57   :  { %698 = vmatprep.subr.bf16.mxu1 %v995_v0  ;;  %739 = vmatprep.subr.bf16.mxu0 %v998_v1 }
  0x5a   :  { %699 = vmatpush1.bf16.msra.mxu1 %v993_v2  ;;  %740 = vmatpush1.bf16.msra.mxu0 %v996_v3  ;;  %v766_v2 = vld [vmem:[%s1200_s5] sm:$0x3] }
  0x5b   :  { %700 = vmatprep.subr.bf16.mxu1 %v1001_v4  ;;  %741 = vmatprep.subr.bf16.mxu0 %v1004_v5 }
  0x5e   :  { %701 = vmatpush1.bf16.msra.mxu1 %v999_v6  ;;  %742 = vmatpush1.bf16.msra.mxu0 %v1002_v7 }
  0x5f   :  { %702 = vmatprep.subr.bf16.mxu1 %v1007_v8  ;;  %743 = vmatprep.subr.bf16.mxu0 %v1010_v9 }
  0x62   :  { %703 = vmatpush1.bf16.msra.mxu1 %v1005_v10  ;;  %744 = vmatpush1.bf16.msra.mxu0 %v1008_v11 }
  0x63   :  { %704 = vmatprep.subr.bf16.mxu1 %v1013_v13  ;;  %745 = vmatprep.subr.bf16.mxu0 %v1016_v14  ;;  %v771_v13 = vrot.slane %v766_v2, %v77_v33 }
  0x66   :  { %705 = vmatpush1.bf16.msra.mxu1 %v1011_v15  ;;  %746 = vmatpush1.bf16.msra.mxu0 %v1014_v16  ;;  %v775_v15 = vrot.slane %v766_v2, %v81_v36 }
  0x67   :  { %706 = vmatprep.subr.bf16.mxu1 %v1019_v17  ;;  %747 = vmatprep.subr.bf16.mxu0 %v1022_v18 }
  0x6a   :  { %707 = vmatpush1.bf16.msra.mxu1 %v1017_v19  ;;  %748 = vmatpush1.bf16.msra.mxu0 %v1020_v20 }
  0x6b   :  { %708 = vmatprep.subr.bf16.mxu1 %v1025_v21  ;;  %749 = vmatprep.subr.bf16.mxu0 %v1028_v22  ;;  %v914_v21 = vld [vmem:[#allocation2] ss:$0 sm:$0xff] }
  0x6e   :  { %709 = vmatpush1.bf16.msra.mxu1 %v1023_v23  ;;  %750 = vmatpush1.bf16.msra.mxu0 %v1026_v24 }
  0x6f   :  { %710 = vmatprep.subr.bf16.mxu1 %v1031_v25  ;;  %751 = vmatprep.subr.bf16.mxu0 %v1034_v26 }
  0x72   :  { %711 = vmatpush1.bf16.msra.mxu1 %v1029_v27  ;;  %752 = vmatpush1.bf16.msra.mxu0 %v1032_v28 }
  0x73   :  { %712 = vmatprep.subr.bf16.mxu1 %v1037_v29  ;;  %753 = vmatprep.subr.bf16.mxu0 %v1040_v30 }
  0x76   :  { %713 = vmatpush1.bf16.msra.mxu1 %v1035_v31  ;;  %754 = vmatpush1.bf16.msra.mxu0 %v1038_v32 }
 0x10c   :  { %v230_v42 = vpop.f32.mrb[0].mxu0  ;;  %v271_v43 = vpop.f32.mrb[0].mxu1 }
 0x10d   :  { %v231_v44 = vadd.f32 %v230_v42, %v78_v38  ;;  %v272_v45 = vadd.f32 %v271_v43, %v86_v39  ;;  %v232_v46 = vpop.f32.mrb[1].mxu0  ;;  %v273_v47 = vpop.f32.mrb[1].mxu1 }
 0x10e   :  { %v233_v48 = vadd.f32 %v232_v46, %v82_v40  ;;  %v274_v49 = vadd.f32 %v273_v47, %v90_v41  ;;  %v234_v50 = vpop.f32.mrb[2].mxu0  ;;  %v275_v51 = vpop.f32.mrb[2].mxu1 }
 0x10f   :  { %v278_v52 = vmax.f32 %v231_v44, 0.0  ;;  %v280_v53 = vmax.f32 %v272_v45, 0.0  ;;  %v235_v54 = vpop.f32.mrb[3].mxu0  ;;  %v276_v55 = vpop.f32.mrb[3].mxu1 }
 0x110   :  { %v279_v56 = vmax.f32 %v233_v48, 0.0  ;;  %v281_v12 = vmax.f32 %v274_v49, 0.0 }
 0x111   :  { %v284_v57 = vpack.c.bf16 %v280_v53, %v280_v53  ;;  %v282_v60 = vpack.c.bf16 %v278_v52, %v278_v52 }
 0x112   :  { %v283_v58 = vpack.c.bf16 %v279_v56, %v279_v56  ;;  %v285_v59 = vpack.c.bf16 %v281_v12, %v281_v12 }
 0x114   :  { %714 = vmatprep.mubr.bf16.mxu1 %v283_v58  ;;  %755 = vmatprep.mubr.bf16.mxu0 %v285_v59 }
 0x115   :  { %715 = vmatmul.mubr.bf16.vlgmr.msra.gmra.mrb[4].mxu1 %v282_v60  ;;  %756 = vmatmul.mubr.bf16.vlgmr.msra.gmra.mrb[4].mxu0 %v284_v57 }
 0x1e8   :  { %v716_v0 = vpop.f32.mrb[4].mxu1  ;;  %v757_v1 = vpop.f32.mrb[4].mxu0 }
 0x1e9   :  { %v717_v3 = vadd.f32 %v716_v0, %v355_v62  ;;  %v718_v4 = vpop.f32.mrb[5].mxu1  ;;  %v759_v5 = vpop.f32.mrb[5].mxu0 }
 0x1ea   :  { %v719_v6 = vadd.f32 %v718_v4, %v359_v63  ;;  %v720_v7 = vpop.f32.mrb[6].mxu1  ;;  %v761_v8 = vpop.f32.mrb[6].mxu0 }
 0x1eb   :  { %v758_v9 = vadd.f32 %v757_v1, %v717_v3  ;;  %v721_v10 = vpop.f32.mrb[7].mxu1  ;;  %v762_v11 = vpop.f32.mrb[7].mxu0 }
 0x1ec   :  { %v760_v14 = vadd.f32 %v759_v5, %v719_v6 }
 0x1ed   :  { %v764_v16 = vmax.f32 %v758_v9, 0.0 }
 0x1ee   :  { %v765_v17 = vmax.f32 %v760_v14, 0.0 }
 0x1ef   :  { %v778_v18 = vmul.f32 %v771_v13, %v764_v16 }
 0x1f0   :  { %v779_v19 = vmul.f32 %v775_v15, %v765_v17 }
 0x1f2   :  { %v780_v20 = vadd.f32 %v779_v19, %v778_v18 }
 0x1f4   :  { %781 = vadd.xlane.f32.xlu0 %v780_v20 }
 0x281   :  { %v782_v22 = vpop.xlane.xlu0 %781 }
 0x282   :  { %v790_v23 = vadd.f32 %v914_v21, %v782_v22 }
 0x284   :  { %792 = vst.msk [vmem:[#allocation7] sm:$0xff] %vm791_vm2, %v790_v23 }
 0x28b   :  { %v810_v24 = vld [vmem:[#allocation7] sm:$0x3] }
 0x28c   :  { %811 = vst [vmem:[%s1202_s7] sm:$0x3] %v810_v24 }
 0x28d   :  { %828 = vsyncpa [#allocation4], 1 }
 0x28e   :  { %829 = vsyncpa [#allocation6], 1 }

</bundles_post_ra>
